<compile_context>
chip_gen: v5e
topology: v5e:2x2
jax: 0.10.0
libtpu: 0.0.40
codegen_flags: <defaults>
</compile_context>

<pallas_src>
import jax
import jax.numpy as jnp
from jax.experimental import pallas as pl
from jax.experimental.pallas import tpu as pltpu


def _round_up(n, m):
    return ((n + m - 1) // m) * m


def controller_actor_kernel(scale_ref,            # SMEM (1,1) f32
                            xg_ref,               # VMEM (TB, Kin) bf16  (lane-padded [x;g])
                            w1_ref, b1_ref,       # VMEM (Kin, Hp) bf16, (1, Hp) f32
                            w2_ref, b2_ref,       # VMEM (Hp, Hp)  bf16, (1, Hp) f32
                            w3_ref, b3_ref,       # VMEM (Hp, Ap)  bf16, (1, Ap) f32
                            out_ref):             # VMEM (TB, Ap)  f32   (lane-padded out)
    bf16 = jnp.bfloat16
    f32 = jnp.float32

    # Layer 1: lane-padded [x;g] (already bf16) @ W1, f32 accumulate, bias + relu.
    h1 = jnp.dot(xg_ref[...], w1_ref[...], preferred_element_type=f32) + b1_ref[...]
    h1 = jnp.maximum(h1, 0.0)

    # Layer 2 + relu (bf16 LHS cast; f32 accumulate / epilogue).
    h2 = jnp.dot(h1.astype(bf16), w2_ref[...], preferred_element_type=f32) + b2_ref[...]
    h2 = jnp.maximum(h2, 0.0)

    # Layer 3: tanh (max_action = 1), then ControllerActor scale.
    a = jnp.tanh(jnp.dot(h2.astype(bf16), w3_ref[...], preferred_element_type=f32)
                 + b3_ref[...])
    out_ref[...] = scale_ref[0, 0] * a


def controller_actor_forward(x, g, params, action_dim, *, batch_tile=1024):
    """x: [B, state_dim] f32, g: [B, goal_dim] f32 -> [B, action_dim] f32."""
    B = x.shape[0]
    Kin = params["w1"].shape[0]      # padded input width (128)
    Hp = params["w2"].shape[0]       # padded hidden (384)
    Ap = params["w3"].shape[1]       # padded action width (128)

    # Single lane-dense bf16 input slab: concat + zero-pad lanes to Kin.
    xg = jnp.concatenate([x, g], axis=1).astype(jnp.bfloat16)
    xg = jnp.pad(xg, ((0, 0), (0, Kin - xg.shape[1])))

    # Batch tiling: one tile for small batches; otherwise >= 2 tiles (so the
    # "parallel" axis really uses both v7x TensorCores) with tiles as large as
    # batch_tile allows to amortize the ~0.35 us/step grid overhead.
    if B <= 256:
        TB, n_tiles = B, 1
    else:
        n_tiles = max(2, pl.cdiv(B, batch_tile))
        TB = _round_up(pl.cdiv(B, n_tiles), 8)
    Bp = TB * n_tiles
    if Bp != B:
        xg = jnp.pad(xg, ((0, Bp - B), (0, 0)))

    # Scoped-VMEM limit only matters for very large tiles (v5e default is 16 MiB).
    est = (2 * TB * Kin * 2                               # xg tiles (bf16, double-buffered)
           + 2 * TB * Ap * 4                              # out tiles (f32, double-buffered)
           + 2 * (Kin * Hp + Hp * Hp + Hp * Ap) * 2       # resident bf16 weights (x2 buffers)
           + 4 * TB * Hp * 4)                             # f32/bf16 intermediates (generous)
    vmem_limit = min(max(32 << 20, 2 * est), 56 << 20) if est > (12 << 20) else None

    smem_scalar = pl.BlockSpec(memory_space=pltpu.MemorySpace.SMEM)

    def const_spec(r, c):
        # Constant index_map: block never changes across grid steps, so the
        # weight/bias tile is DMA'd once and stays resident in VMEM.
        return pl.BlockSpec((r, c), lambda i: (0, 0))

    out = pl.pallas_call(
        controller_actor_kernel,
        out_shape=jax.ShapeDtypeStruct((Bp, Ap), jnp.float32),
        grid=(n_tiles,),
        in_specs=[
            smem_scalar,                                   # scale
            pl.BlockSpec((TB, Kin), lambda i: (i, 0)),     # [x;g] slab (grid-indexed)
            const_spec(Kin, Hp), const_spec(1, Hp),        # W1, b1
            const_spec(Hp, Hp), const_spec(1, Hp),         # W2, b2
            const_spec(Hp, Ap), const_spec(1, Ap),         # W3, b3
        ],
        out_specs=pl.BlockSpec((TB, Ap), lambda i: (i, 0)),
        compiler_params=pltpu.CompilerParams(
            dimension_semantics=("parallel",),             # batch axis across v7x's 2 TCs
            vmem_limit_bytes=vmem_limit),
    )(params["scale"], xg,
      params["w1"], params["b1"],
      params["w2"], params["b2"],
      params["w3"], params["b3"])

    return out[:B, :action_dim]


def init_params(key, state_dim, goal_dim, action_dim, hidden_dim=300):
    """nn.Linear-style init (U[-1/sqrt(fan_in), +1/sqrt(fan_in)]), weights stored [in, out].

    W1 rows are zero-padded from state_dim+goal_dim to 128 (merged [x;g] input), the
    hidden dim is zero-padded to a multiple of 128, and W3/b3 columns are zero-padded
    to 128 for a lane-dense output.  All padding is exact (zero rows/cols/bias lanes,
    relu(0)=0, tanh(0)=0 on sliced-off lanes).  Weights bf16; biases/scale f32.
    """
    H = hidden_dim
    Hp = _round_up(H, 128)
    in1 = state_dim + goal_dim
    Kin = _round_up(in1, 128)
    Ap = _round_up(action_dim, 128)
    ks = jax.random.split(key, 6)

    def lin(kw, kb, fan_in, fan_out):
        bound = 1.0 / jnp.sqrt(jnp.float32(fan_in))
        w = jax.random.uniform(kw, (fan_in, fan_out), jnp.float32, -bound, bound)
        b = jax.random.uniform(kb, (1, fan_out), jnp.float32, -bound, bound)
        return w, b

    w1, b1 = lin(ks[0], ks[1], in1, H)
    w2, b2 = lin(ks[2], ks[3], H, H)
    w3, b3 = lin(ks[4], ks[5], H, action_dim)

    def pad2(a, rows, cols):
        return jnp.pad(a, ((0, rows - a.shape[0]), (0, cols - a.shape[1])))

    return {
        "scale": jnp.ones((1, 1), jnp.float32),            # ControllerActor(scale=1)
        "w1": pad2(w1, Kin, Hp).astype(jnp.bfloat16),
        "b1": pad2(b1, 1, Hp),
        "w2": pad2(w2, Hp, Hp).astype(jnp.bfloat16),
        "b2": pad2(b2, 1, Hp),
        "w3": pad2(w3, Hp, Ap).astype(jnp.bfloat16),
        "b3": pad2(b3, 1, Ap),
    }


def reference_forward(x, g, params, action_dim):
    """Pure-JAX reference mirroring the kernel's bf16-weight / f32-accumulate math."""
    bf16, f32 = jnp.bfloat16, jnp.float32
    Kin = params["w1"].shape[0]
    xg = jnp.concatenate([x, g], axis=1).astype(bf16)
    xg = jnp.pad(xg, ((0, 0), (0, Kin - xg.shape[1])))
    h1 = jnp.maximum(
        jnp.dot(xg, params["w1"], preferred_element_type=f32) + params["b1"], 0.0)
    h2 = jnp.maximum(
        jnp.dot(h1.astype(bf16), params["w2"], preferred_element_type=f32) + params["b2"],
        0.0)
    a = jnp.tanh(
        jnp.dot(h2.astype(bf16), params["w3"], preferred_element_type=f32) + params["b3"])
    return (params["scale"][0, 0] * a)[:, :action_dim]


# TODO(synk): sample_action_logprob (Normal sampling / log_prob) is out of scope;
# only ControllerActor.forward is implemented as a kernel.

if __name__ == "__main__":
    key = jax.random.PRNGKey(0)
    k_x, k_g, k_p = jax.random.split(key, 3)

    B, state_dim, goal_dim, action_dim = 2, 16, 8, 8
    hidden_dim = 300  # Actor default (padded to 384 internally)

    x = jax.random.normal(k_x, (B, state_dim), jnp.float32)
    g = jax.random.normal(k_g, (B, goal_dim), jnp.float32)
    params = init_params(k_p, state_dim, goal_dim, action_dim, hidden_dim)

    out = controller_actor_forward(x, g, params, action_dim)
    jax.block_until_ready(out)

    ref = reference_forward(x, g, params, action_dim)
    assert out.shape == (B, action_dim)
    assert jnp.allclose(out, ref, atol=1e-2, rtol=1e-2), float(jnp.max(jnp.abs(out - ref)))

    print("KERNEL_OK")
</pallas_src>

<mosaic_0001>
module attributes {stable_mosaic.version = 11 : i64} {
  func.func @controller_actor_kernel(%arg0: i32, %arg1: memref<1x1xf32, #tpu.memory_space<smem>>, %arg2: memref<2x128xbf16, #tpu.memory_space<vmem>>, %arg3: memref<128x384xbf16, #tpu.memory_space<vmem>>, %arg4: memref<1x384xf32, #tpu.memory_space<vmem>>, %arg5: memref<384x384xbf16, #tpu.memory_space<vmem>>, %arg6: memref<1x384xf32, #tpu.memory_space<vmem>>, %arg7: memref<384x128xbf16, #tpu.memory_space<vmem>>, %arg8: memref<1x128xf32, #tpu.memory_space<vmem>>, %arg9: memref<2x128xf32, #tpu.memory_space<vmem>>) attributes {dimension_semantics = [#tpu.dimension_semantics<parallel>], iteration_bounds = array<i64: 1>, scalar_prefetch = 0 : i64, scratch_operands = 0 : i64, tpu.core_type = #tpu.core_type<tc>, window_params = [{transform_indices = @transform_0, window_bounds = array<i64: 1, 1>}, {transform_indices = @transform_1, window_bounds = array<i64: 2, 128>}, {pipeline_mode = #tpu.pipeline_mode<synchronous>, transform_indices = @transform_2, window_bounds = array<i64: 128, 384>}, {pipeline_mode = #tpu.pipeline_mode<synchronous>, transform_indices = @transform_3, window_bounds = array<i64: 1, 384>}, {pipeline_mode = #tpu.pipeline_mode<synchronous>, transform_indices = @transform_4, window_bounds = array<i64: 384, 384>}, {pipeline_mode = #tpu.pipeline_mode<synchronous>, transform_indices = @transform_5, window_bounds = array<i64: 1, 384>}, {pipeline_mode = #tpu.pipeline_mode<synchronous>, transform_indices = @transform_6, window_bounds = array<i64: 384, 128>}, {pipeline_mode = #tpu.pipeline_mode<synchronous>, transform_indices = @transform_7, window_bounds = array<i64: 1, 128>}, {transform_indices = @transform_8, window_bounds = array<i64: 2, 128>}]} {
    %c0 = arith.constant 0 : index
    %c0_0 = arith.constant 0 : index
    %0 = vector.load %arg2[%c0, %c0_0] : memref<2x128xbf16, #tpu.memory_space<vmem>>, vector<2x128xbf16>
    %c0_1 = arith.constant 0 : index
    %c0_2 = arith.constant 0 : index
    %1 = vector.load %arg3[%c0_1, %c0_2] : memref<128x384xbf16, #tpu.memory_space<vmem>>, vector<128x384xbf16>
    %cst = arith.constant dense<0.000000e+00> : vector<2x384xf32>
    %2 = tpu.matmul %0, %1, %cst {dimension_numbers = #tpu.dot_dimension_numbers<[1], [0], [0], [1], [0, 0, 1, 1], [], []>} : vector<2x128xbf16>, vector<128x384xbf16>, vector<2x384xf32> -> vector<2x384xf32>
    %c0_3 = arith.constant 0 : index
    %c0_4 = arith.constant 0 : index
    %3 = vector.load %arg4[%c0_3, %c0_4] : memref<1x384xf32, #tpu.memory_space<vmem>>, vector<1x384xf32>
    %4 = vector.broadcast %3 : vector<1x384xf32> to vector<2x384xf32>
    %5 = arith.addf %2, %4 : vector<2x384xf32>
    %cst_5 = arith.constant 0.000000e+00 : f32
    %6 = vector.broadcast %cst_5 : f32 to vector<2x384xf32>
    %7 = arith.maximumf %5, %6 : vector<2x384xf32>
    %8 = arith.truncf %7 : vector<2x384xf32> to vector<2x384xbf16>
    %c0_6 = arith.constant 0 : index
    %c0_7 = arith.constant 0 : index
    %9 = vector.load %arg5[%c0_6, %c0_7] : memref<384x384xbf16, #tpu.memory_space<vmem>>, vector<384x384xbf16>
    %cst_8 = arith.constant dense<0.000000e+00> : vector<2x384xf32>
    %10 = tpu.matmul %8, %9, %cst_8 {dimension_numbers = #tpu.dot_dimension_numbers<[1], [0], [0], [1], [0, 0, 1, 1], [], []>} : vector<2x384xbf16>, vector<384x384xbf16>, vector<2x384xf32> -> vector<2x384xf32>
    %c0_9 = arith.constant 0 : index
    %c0_10 = arith.constant 0 : index
    %11 = vector.load %arg6[%c0_9, %c0_10] : memref<1x384xf32, #tpu.memory_space<vmem>>, vector<1x384xf32>
    %12 = vector.broadcast %11 : vector<1x384xf32> to vector<2x384xf32>
    %13 = arith.addf %10, %12 : vector<2x384xf32>
    %cst_11 = arith.constant 0.000000e+00 : f32
    %14 = vector.broadcast %cst_11 : f32 to vector<2x384xf32>
    %15 = arith.maximumf %13, %14 : vector<2x384xf32>
    %16 = arith.truncf %15 : vector<2x384xf32> to vector<2x384xbf16>
    %c0_12 = arith.constant 0 : index
    %c0_13 = arith.constant 0 : index
    %17 = vector.load %arg7[%c0_12, %c0_13] : memref<384x128xbf16, #tpu.memory_space<vmem>>, vector<384x128xbf16>
    %cst_14 = arith.constant dense<0.000000e+00> : vector<2x128xf32>
    %18 = tpu.matmul %16, %17, %cst_14 {dimension_numbers = #tpu.dot_dimension_numbers<[1], [0], [0], [1], [0, 0, 1, 1], [], []>} : vector<2x384xbf16>, vector<384x128xbf16>, vector<2x128xf32> -> vector<2x128xf32>
    %c0_15 = arith.constant 0 : index
    %c0_16 = arith.constant 0 : index
    %19 = vector.load %arg8[%c0_15, %c0_16] : memref<1x128xf32, #tpu.memory_space<vmem>>, vector<1x128xf32>
    %20 = vector.broadcast %19 : vector<1x128xf32> to vector<2x128xf32>
    %21 = arith.addf %18, %20 : vector<2x128xf32>
    %22 = math.tanh %21 : vector<2x128xf32>
    %c0_17 = arith.constant 0 : index
    %c0_18 = arith.constant 0 : index
    %23 = memref.load %arg1[%c0_17, %c0_18] : memref<1x1xf32, #tpu.memory_space<smem>>
    %24 = vector.broadcast %23 : f32 to vector<2x128xf32>
    %25 = arith.mulf %24, %22 : vector<2x128xf32>
    %c0_19 = arith.constant 0 : index
    %c0_20 = arith.constant 0 : index
    %26 = vector.load %arg9[%c0_19, %c0_20] : memref<2x128xf32, #tpu.memory_space<vmem>>, vector<2x128xf32>
    tpu.vector_store %arg9[%c0_19, %c0_20], %25 {strides = array<i32>} : memref<2x128xf32, #tpu.memory_space<vmem>>, vector<2x128xf32>,
    return
  }
  func.func @transform_0(%arg0: i32) -> (i32, i32) {
    %c0_i32 = arith.constant 0 : i32
    %c0_i32_0 = arith.constant 0 : i32
    %c0_i32_1 = arith.constant 0 : i32
    return %c0_i32, %c0_i32_0 : i32, i32
  }
  func.func @transform_1(%arg0: i32) -> (i32, i32) {
    %c0_i32 = arith.constant 0 : i32
    %c0_i32_0 = arith.constant 0 : i32
    return %arg0, %c0_i32 : i32, i32
  }
  func.func @transform_2(%arg0: i32) -> (i32, i32) {
    %c0_i32 = arith.constant 0 : i32
    %c0_i32_0 = arith.constant 0 : i32
    %c0_i32_1 = arith.constant 0 : i32
    return %c0_i32, %c0_i32_0 : i32, i32
  }
  func.func @transform_3(%arg0: i32) -> (i32, i32) {
    %c0_i32 = arith.constant 0 : i32
    %c0_i32_0 = arith.constant 0 : i32
    %c0_i32_1 = arith.constant 0 : i32
    return %c0_i32, %c0_i32_0 : i32, i32
  }
  func.func @transform_4(%arg0: i32) -> (i32, i32) {
    %c0_i32 = arith.constant 0 : i32
    %c0_i32_0 = arith.constant 0 : i32
    %c0_i32_1 = arith.constant 0 : i32
    return %c0_i32, %c0_i32_0 : i32, i32
  }
  func.func @transform_5(%arg0: i32) -> (i32, i32) {
    %c0_i32 = arith.constant 0 : i32
    %c0_i32_0 = arith.constant 0 : i32
    %c0_i32_1 = arith.constant 0 : i32
    return %c0_i32, %c0_i32_0 : i32, i32
  }
  func.func @transform_6(%arg0: i32) -> (i32, i32) {
    %c0_i32 = arith.constant 0 : i32
    %c0_i32_0 = arith.constant 0 : i32
    %c0_i32_1 = arith.constant 0 : i32
    return %c0_i32, %c0_i32_0 : i32, i32
  }
  func.func @transform_7(%arg0: i32) -> (i32, i32) {
    %c0_i32 = arith.constant 0 : i32
    %c0_i32_0 = arith.constant 0 : i32
    %c0_i32_1 = arith.constant 0 : i32
    return %c0_i32, %c0_i32_0 : i32, i32
  }
  func.func @transform_8(%arg0: i32) -> (i32, i32) {
    %c0_i32 = arith.constant 0 : i32
    %c0_i32_0 = arith.constant 0 : i32
    return %arg0, %c0_i32 : i32, i32
  }
}

</mosaic_0001>

<bundles_post_ra>
// kernel: tpu_custom_call.1
= control target key start
LH: loop header
LB: loop body
LE: loop exit
PB: predicated region body
PF: predicated region fallthrough
CT: control target
= control target key end

     0   :  { %14 = vsyncpa [#allocation4], 0  ;;  %s2036_s0 = inlined_call_operand.<no memory space> [shape: f32[1,1], index: 0, kind: input, shape index: {}]   ;;  %s2037_s1 = inlined_call_operand.hbm [shape: bf16[2,128], index: 1, kind: input, shape index: {}]   ;;  %s2038_s2 = inlined_call_operand.hbm [shape: bf16[128,384], index: 2, kind: input, shape index: {}]   ;;  %s2039_s3 = inlined_call_operand.vmem [shape: f32[1,384], index: 3, kind: input, shape index: {}]   ;;  %s2040_s4 = inlined_call_operand.hbm [shape: bf16[384,384], index: 4, kind: input, shape index: {}]   ;;  %s2041_s5 = inlined_call_operand.hbm [shape: f32[1,384], index: 5, kind: input, shape index: {}]   ;;  %s2042_s6 = inlined_call_operand.hbm [shape: bf16[384,128], index: 6, kind: input, shape index: {}]   ;;  %s2043_s7 = inlined_call_operand.vmem [shape: f32[1,128], index: 7, kind: input, shape index: {}]   ;;  %s2044_s8 = inlined_call_operand.hbm [shape: f32[2,128], index: 8, kind: output, shape index: {}]  }
   0x1   :  { %15 = vsyncpa [#allocation7], 0 }
   0x2   :  { %16 = vsyncpa [#allocation10], 0  ;;  %s35_s29 = sshll.u32 %s2038_s2, 4  ;;  %s36_s29 = int_to_ptr.hbm [resolvable:$true] %s35_s29 }
   0x3   :  { %17 = vsyncpa [#allocation5], 0  ;;  %s1954_s30 = smov [#allocation6]   ;;  %s64_s12 = sshll.u32 %s2041_s5, 4  ;;  %s65_s12 = int_to_ptr.hbm [resolvable:$true] %s64_s12 }
   0x4   :  { %s37_s9 = sshll.u32 %s1954_s30, 4  ;;  %s1955_s13 = smov 192   ;;  %s38_s9 = int_to_ptr.vmem [resolvable:$true] %s37_s9 }
   0x5   :  { %s1956_s14 = smov 12   ;;  %s1957_s15 = smov [#allocation9]  }
   0x6   :  { %43 = dma.hbm_to_vmem [thread:$0]  %s36_s29, 3072, %s38_s9, [#allocation7], %s1955_s13, %s1955_s13, %s1956_s14  }
   0x7   :  { %s66_s16 = sshll.u32 %s1957_s15, 4  ;;  %s25_s19 = sshll.u32 %s2037_s1, 4  ;;  %s67_s16 = int_to_ptr.vmem [resolvable:$true] %s66_s16  ;;  %s26_s19 = int_to_ptr.hbm [resolvable:$true] %s25_s19 }
   0x8   :  { %69 = dma.hbm_to_vmem [thread:$0]  %s65_s12, 48, %s67_s16, [#allocation10]  }
   0x9   :  { %s50_s21 = sshll.u32 %s2040_s4, 4  ;;  %s1958_s22 = smov [#allocation3]   ;;  %s51_s21 = int_to_ptr.hbm [resolvable:$true] %s50_s21 }
   0xa   :  { %s27_s23 = sshll.u32 %s1958_s22, 4  ;;  %s1959_s5 = smov [#allocation8]   ;;  %s28_s23 = int_to_ptr.vmem [resolvable:$true] %s27_s23 }
   0xb   :  { %30 = dma.hbm_to_vmem [thread:$0]  %s26_s19, 16, %s28_s23, [#allocation4]  }
   0xc   :  { %s52_s24 = sshll.u32 %s1959_s5, 4  ;;  %s74_s27 = sshll.u32 %s2042_s6, 4  ;;  %s53_s24 = int_to_ptr.vmem [resolvable:$true] %s52_s24  ;;  %s75_s27 = int_to_ptr.hbm [resolvable:$true] %s74_s27 }
   0xd   :  { %58 = dma.hbm_to_vmem [thread:$0]  %s51_s21, 9216, %s53_s24, [#allocation7], %s1955_s13, %s1955_s13, %s1956_s14  }
   0xe   :  { %s1960_s1 = smov [#allocation11]   ;;  %s1961_s29 = smov 64  }
   0xf   :  { %s76_s28 = sshll.u32 %s1960_s1, 4  ;;  %s1962_s30 = smov 4   ;;  %s77_s28 = int_to_ptr.vmem [resolvable:$true] %s76_s28 }
  0x10   :  { %82 = dma.hbm_to_vmem [thread:$0]  %s75_s27, 3072, %s77_s28, [#allocation10], %s1961_s29, %s1961_s29, %s1962_s30  }
  0x11   :  { %1946 = dma.done.wait [#allocation4], 16  }
  0x12   :  { %1947 = vsyncadd [#allocation4], 4294967280 }
  0x13   :  { %1948 = dma.done.wait [#allocation7], 12288  }
  0x14   :  { %1949 = vsyncadd [#allocation7], 4294955008 }
  0x15   :  { %1950 = dma.done.wait [#allocation10], 3120  }
  0x16   :  { %1951 = vsyncadd [#allocation10], 4294964176  ;;  %v1275_v0 = vld [vmem:[#allocation6 + $0xa8] sm:$0xf]  ;;  %v1691_v1 = vld [vmem:[#allocation6 + $0xb0] sm:$0xf0] }
  0x17   :  { %v1690_v2 = vld [vmem:[#allocation6 + $0xac] sm:$0xf]  ;;  %v1276_v3 = vor.u32 %v1691_v1, %v1275_v0  ;;  %v1277_v4 = vld [vmem:[#allocation6 + $0xb4] sm:$0xf0]  ;;  %v1283_v5 = vld [vmem:[#allocation6 + $0xb0] sm:$0xf] }
  0x18   :  { %v1692_v6 = vld [vmem:[#allocation6 + $0xb8] sm:$0xf0]  ;;  %v1280_v7 = vor.u32 %v1690_v2, %v1277_v4  ;;  %v1263_v9 = vld [vmem:[#allocation6 + $0x90] sm:$0xf]  ;;  %v1687_v11 = vld [vmem:[#allocation6 + $0x94] sm:$0xf] }
  0x19   :  { %v1284_v8 = vor.u32 %v1692_v6, %v1283_v5  ;;  %v1688_v10 = vld [vmem:[#allocation6 + $0x98] sm:$0xf0]  ;;  %274 = vmatpush.bf16.msra.mxu0 %v1276_v3  ;;  %v1265_v13 = vld [vmem:[#allocation6 + $0x9c] sm:$0xf0]  ;;  %v1271_v14 = vld [vmem:[#allocation6 + $0x98] sm:$0xf] }
  0x1a   :  { %v1264_v12 = vor.u32 %v1688_v10, %v1263_v9  ;;  %v1689_v15 = vld [vmem:[#allocation6 + $0xa0] sm:$0xf0]  ;;  %287 = vmatpush.bf16.msra.mxu1 %v1280_v7  ;;  %v1268_v16 = vor.u32 %v1687_v11, %v1265_v13  ;;  %v1251_v18 = vld [vmem:[#allocation6 + $0x78] sm:$0xf]  ;;  %v1684_v20 = vld [vmem:[#allocation6 + $0x7c] sm:$0xf] }
  0x1b   :  { %300 = vmatpush.bf16.msra.mxu2 %v1284_v8  ;;  %v1272_v17 = vor.u32 %v1689_v15, %v1271_v14  ;;  %v1685_v19 = vld [vmem:[#allocation6 + $0x80] sm:$0xf0]  ;;  %v1253_v21 = vld [vmem:[#allocation6 + $0x84] sm:$0xf0]  ;;  %v1259_v22 = vld [vmem:[#allocation6 + $0x80] sm:$0xf] }
  0x1c   :  { %v1686_v23 = vld [vmem:[#allocation6 + $0x88] sm:$0xf0]  ;;  %v1252_v24 = vor.u32 %v1685_v19, %v1251_v18  ;;  %v1256_v25 = vor.u32 %v1684_v20, %v1253_v21  ;;  %v1239_v27 = vld [vmem:[#allocation6 + $0x60] sm:$0xf]  ;;  %v1681_v29 = vld [vmem:[#allocation6 + $0x64] sm:$0xf] }
  0x1d   :  { %275 = vmatpush.bf16.msra.mxu0 %v1264_v12  ;;  %v1260_v26 = vor.u32 %v1686_v23, %v1259_v22  ;;  %v1682_v28 = vld [vmem:[#allocation6 + $0x68] sm:$0xf0]  ;;  %v1241_v30 = vld [vmem:[#allocation6 + $0x6c] sm:$0xf0]  ;;  %v1247_v31 = vld [vmem:[#allocation6 + $0x68] sm:$0xf] }
  0x1e   :  { %288 = vmatpush.bf16.msra.mxu1 %v1268_v16  ;;  %v1683_v32 = vld [vmem:[#allocation6 + $0x70] sm:$0xf0]  ;;  %v1240_v33 = vor.u32 %v1682_v28, %v1239_v27  ;;  %v1244_v34 = vor.u32 %v1681_v29, %v1241_v30  ;;  %v1227_v36 = vld [vmem:[#allocation6 + $0x48] sm:$0xf]  ;;  %v1678_v38 = vld [vmem:[#allocation6 + $0x4c] sm:$0xf] }
  0x1f   :  { %301 = vmatpush.bf16.msra.mxu2 %v1272_v17  ;;  %v1248_v35 = vor.u32 %v1683_v32, %v1247_v31  ;;  %v1679_v37 = vld [vmem:[#allocation6 + $0x50] sm:$0xf0]  ;;  %v1229_v39 = vld [vmem:[#allocation6 + $0x54] sm:$0xf0]  ;;  %v1235_v40 = vld [vmem:[#allocation6 + $0x50] sm:$0xf] }
  0x20   :  { %v1680_v41 = vld [vmem:[#allocation6 + $0x58] sm:$0xf0]  ;;  %v1215_v42 = vld [vmem:[#allocation6 + $0x30] sm:$0xf]  ;;  %v1228_v43 = vor.u32 %v1679_v37, %v1227_v36  ;;  %v1675_v45 = vld [vmem:[#allocation6 + $0x34] sm:$0xf]  ;;  %v1232_v47 = vor.u32 %v1678_v38, %v1229_v39 }
  0x21   :  { %276 = vmatpush.bf16.msra.mxu0 %v1252_v24  ;;  %v1676_v44 = vld [vmem:[#allocation6 + $0x38] sm:$0xf0]  ;;  %v1217_v46 = vld [vmem:[#allocation6 + $0x3c] sm:$0xf0]  ;;  %v1236_v48 = vor.u32 %v1680_v41, %v1235_v40  ;;  %v1223_v49 = vld [vmem:[#allocation6 + $0x38] sm:$0xf] }
  0x22   :  { %289 = vmatpush.bf16.msra.mxu1 %v1256_v25  ;;  %v1371_v50 = vld [vmem:[#allocation8 + $0xa8] sm:$0xf]  ;;  %v1715_v51 = vld [vmem:[#allocation8 + $0xb0] sm:$0xf0]  ;;  %v1677_v52 = vld [vmem:[#allocation6 + $0x40] sm:$0xf0]  ;;  %v1216_v56 = vor.u32 %v1676_v44, %v1215_v42  ;;  %v1220_v60 = vor.u32 %v1675_v45, %v1217_v46 }
  0x23   :  { %302 = vmatpush.bf16.msra.mxu2 %v1260_v26  ;;  %v1372_v53 = vor.u32 %v1715_v51, %v1371_v50  ;;  %v1359_v54 = vld [vmem:[#allocation8 + $0x90] sm:$0xf]  ;;  %v1712_v55 = vld [vmem:[#allocation8 + $0x98] sm:$0xf0]  ;;  %v1203_v57 = vld [vmem:[#allocation6 + $0x18] sm:$0xf]  ;;  %v1224_v61 = vor.u32 %v1677_v52, %v1223_v49 }
  0x24   :  { %v1673_v58 = vld [vmem:[#allocation6 + $0x20] sm:$0xf0]  ;;  %v1360_v59 = vor.u32 %v1712_v55, %v1359_v54  ;;  %v1672_v62 = vld [vmem:[#allocation6 + $0x1c] sm:$0xf]  ;;  %v1347_v63 = vld [vmem:[#allocation8 + $0x78] sm:$0xf] }
  0x25   :  { %277 = vmatpush.bf16.msra.mxu0 %v1240_v33  ;;  %807 = vmatpush.bf16.msra.mxu3 %v1372_v53  ;;  %v1709_v0 = vld [vmem:[#allocation8 + $0x80] sm:$0xf0]  ;;  %v1205_v1 = vld [vmem:[#allocation6 + $0x24] sm:$0xf0]  ;;  %v1211_v2 = vld [vmem:[#allocation6 + $0x20] sm:$0xf]  ;;  %v1204_v4 = vor.u32 %v1673_v58, %v1203_v57 }
  0x26   :  { %290 = vmatpush.bf16.msra.mxu1 %v1244_v34  ;;  %v1674_v3 = vld [vmem:[#allocation6 + $0x28] sm:$0xf0]  ;;  %v1191_v5 = vld [vmem:[#allocation6] sm:$0xf]  ;;  %v1669_v7 = vld [vmem:[#allocation6 + $0x4] sm:$0xf]  ;;  %v1348_v8 = vor.u32 %v1709_v0, %v1347_v63  ;;  %v1208_v9 = vor.u32 %v1672_v62, %v1205_v1 }
  0x27   :  { %303 = vmatpush.bf16.msra.mxu2 %v1248_v35  ;;  %v1670_v6 = vld [vmem:[#allocation6 + $0x8] sm:$0xf0]  ;;  %v1212_v10 = vor.u32 %v1674_v3, %v1211_v2  ;;  %v1193_v11 = vld [vmem:[#allocation6 + $0xc] sm:$0xf0]  ;;  %v1335_v12 = vld [vmem:[#allocation8 + $0x60] sm:$0xf] }
  0x28   :  { %v1706_v13 = vld [vmem:[#allocation8 + $0x68] sm:$0xf0]  ;;  %v1199_v14 = vld [vmem:[#allocation6 + $0x8] sm:$0xf]  ;;  %v1671_v15 = vld [vmem:[#allocation6 + $0x10] sm:$0xf0]  ;;  %v1192_v20 = vor.u32 %v1670_v6, %v1191_v5  ;;  %v1196_v24 = vor.u32 %v1669_v7, %v1193_v11 }
  0x29   :  { %278 = vmatpush.bf16.msra.mxu0 %v1228_v43  ;;  %808 = vmatpush.bf16.msra.mxu3 %v1360_v59  ;;  %v1467_v16 = vld [vmem:[#allocation8 + $0x168] sm:$0xf]  ;;  %v1739_v17 = vld [vmem:[#allocation8 + $0x170] sm:$0xf0]  ;;  %v1714_v18 = vld [vmem:[#allocation8 + $0xac] sm:$0xf]  ;;  %v1336_v21 = vor.u32 %v1706_v13, %v1335_v12  ;;  %v1200_v25 = vor.u32 %v1671_v15, %v1199_v14 }
  0x2a   :  { %291 = vmatpush.bf16.msra.mxu1 %v1232_v47  ;;  %v1373_v19 = vld [vmem:[#allocation8 + $0xb4] sm:$0xf0]  ;;  %v1563_v22 = vld [vmem:[#allocation8 + $0x228] sm:$0xf]  ;;  %v1763_v23 = vld [vmem:[#allocation8 + $0x230] sm:$0xf0]  ;;  %v1468_v26 = vor.u32 %v1739_v17, %v1467_v16 }
  0x2b   :  { %304 = vmatpush.bf16.msra.mxu2 %v1236_v48  ;;  %v1376_v27 = vor.u32 %v1714_v18, %v1373_v19  ;;  %v1323_v28 = vld [vmem:[#allocation8 + $0x48] sm:$0xf]  ;;  %v1703_v29 = vld [vmem:[#allocation8 + $0x50] sm:$0xf0]  ;;  %v1455_v30 = vld [vmem:[#allocation8 + $0x150] sm:$0xf]  ;;  %v1564_v34 = vor.u32 %v1763_v23, %v1563_v22 }
  0x2c   :  { %v1736_v31 = vld [vmem:[#allocation8 + $0x158] sm:$0xf0]  ;;  %v1711_v32 = vld [vmem:[#allocation8 + $0x94] sm:$0xf]  ;;  %v1361_v33 = vld [vmem:[#allocation8 + $0x9c] sm:$0xf0]  ;;  %v1324_v38 = vor.u32 %v1703_v29, %v1323_v28 }
  0x2d   :  { %279 = vmatpush.bf16.msra.mxu0 %v1216_v56  ;;  %809 = vmatpush.bf16.msra.mxu3 %v1348_v8  ;;  %v105_v35 = vld [vmem:[#allocation3] sm:$0x1]  ;;  %v1551_v36 = vld [vmem:[#allocation8 + $0x210] sm:$0xf]  ;;  %v1456_v39 = vor.u32 %v1736_v31, %v1455_v30  ;;  %v1364_v40 = vor.u32 %v1711_v32, %v1361_v33  ;;  %v1443_v43 = vld [vmem:[#allocation8 + $0x138] sm:$0xf] }
  0x2e   :  { %292 = vmatpush.bf16.msra.mxu1 %v1220_v60  ;;  %v1760_v37 = vld [vmem:[#allocation8 + $0x218] sm:$0xf0]  ;;  %v1311_v41 = vld [vmem:[#allocation8 + $0x30] sm:$0xf]  ;;  %v1733_v44 = vld [vmem:[#allocation8 + $0x140] sm:$0xf0] }
  0x2f   :  { %305 = vmatpush.bf16.msra.mxu2 %v1224_v61  ;;  %v1700_v42 = vld [vmem:[#allocation8 + $0x38] sm:$0xf0]  ;;  %v1349_v46 = vld [vmem:[#allocation8 + $0x84] sm:$0xf0]  ;;  %v1552_v47 = vor.u32 %v1760_v37, %v1551_v36  ;;  %v1539_v48 = vld [vmem:[#allocation8 + $0x1f8] sm:$0xf]  ;;  %v1444_v51 = vor.u32 %v1733_v44, %v1443_v43 }
  0x30   :  { %v1708_v45 = vld [vmem:[#allocation8 + $0x7c] sm:$0xf]  ;;  %v1757_v49 = vld [vmem:[#allocation8 + $0x200] sm:$0xf0]  ;;  %v1312_v50 = vor.u32 %v1700_v42, %v1311_v41  ;;  %v1299_v53 = vld [vmem:[#allocation8 + $0x18] sm:$0xf] }
  0x31   :  { %280 = vmatpush.bf16.msra.mxu0 %v1204_v4  ;;  %810 = vmatpush.bf16.msra.mxu3 %v1336_v21  ;;  %v1352_v52 = vor.u32 %v1708_v45, %v1349_v46  ;;  %v1697_v54 = vld [vmem:[#allocation8 + $0x20] sm:$0xf0]  ;;  %v1431_v55 = vld [vmem:[#allocation8 + $0x120] sm:$0xf]  ;;  %v1730_v56 = vld [vmem:[#allocation8 + $0x128] sm:$0xf0]  ;;  %v1540_v59 = vor.u32 %v1757_v49, %v1539_v48 }
  0x32   :  { %293 = vmatpush.bf16.msra.mxu1 %v1208_v9  ;;  %v1705_v57 = vld [vmem:[#allocation8 + $0x64] sm:$0xf]  ;;  %v1337_v58 = vld [vmem:[#allocation8 + $0x6c] sm:$0xf0]  ;;  %v1527_v60 = vld [vmem:[#allocation8 + $0x1e0] sm:$0xf]  ;;  %v1300_v62 = vor.u32 %v1697_v54, %v1299_v53  ;;  %v1432_v0 = vor.u32 %v1730_v56, %v1431_v55 }
  0x33   :  { %306 = vmatpush.bf16.msra.mxu2 %v1212_v10  ;;  %v1754_v61 = vld [vmem:[#allocation8 + $0x1e8] sm:$0xf0]  ;;  %v1287_v63 = vld [vmem:[#allocation8] sm:$0xf]  ;;  %v1340_v1 = vor.u32 %v1705_v57, %v1337_v58  ;;  %v1419_v3 = vld [vmem:[#allocation8 + $0x108] sm:$0xf] }
  0x34   :  { %v1694_v2 = vld [vmem:[#allocation8 + $0x8] sm:$0xf0]  ;;  %v1727_v4 = vld [vmem:[#allocation8 + $0x110] sm:$0xf0]  ;;  %v1325_v6 = vld [vmem:[#allocation8 + $0x54] sm:$0xf0]  ;;  %v1528_v8 = vor.u32 %v1754_v61, %v1527_v60 }
  0x35   :  { %281 = vmatpush.bf16.msra.mxu0 %v1192_v20  ;;  %811 = vmatpush.bf16.msra.mxu3 %v1324_v38  ;;  %v1702_v5 = vld [vmem:[#allocation8 + $0x4c] sm:$0xf]  ;;  %v1469_v9 = vld [vmem:[#allocation8 + $0x174] sm:$0xf0]  ;;  %v1515_v10 = vld [vmem:[#allocation8 + $0x1c8] sm:$0xf]  ;;  %v1288_v12 = vor.u32 %v1694_v2, %v1287_v63  ;;  %v1420_v13 = vor.u32 %v1727_v4, %v1419_v3 }
  0x36   :  { %294 = vmatpush.bf16.msra.mxu1 %v1196_v24  ;;  %v1738_v7 = vld [vmem:[#allocation8 + $0x16c] sm:$0xf]  ;;  %v1751_v11 = vld [vmem:[#allocation8 + $0x1d0] sm:$0xf0]  ;;  %v1328_v14 = vor.u32 %v1702_v5, %v1325_v6  ;;  %v1407_v15 = vld [vmem:[#allocation8 + $0xf0] sm:$0xf] }
  0x37   :  { %307 = vmatpush.bf16.msra.mxu2 %v1200_v25  ;;  %v1724_v16 = vld [vmem:[#allocation8 + $0xf8] sm:$0xf0]  ;;  %v1472_v17 = vor.u32 %v1738_v7, %v1469_v9  ;;  %v1699_v18 = vld [vmem:[#allocation8 + $0x34] sm:$0xf]  ;;  %v1313_v19 = vld [vmem:[#allocation8 + $0x3c] sm:$0xf0]  ;;  %v1516_v21 = vor.u32 %v1751_v11, %v1515_v10 }
  0x38   :  { %282 = vmatmul.bf16.vlgmr.msra.gmra.mxu0 %v105_v35  ;;  %v1735_v20 = vld [vmem:[#allocation8 + $0x154] sm:$0xf]  ;;  %v1457_v22 = vld [vmem:[#allocation8 + $0x15c] sm:$0xf0]  ;;  %v1503_v23 = vld [vmem:[#allocation8 + $0x1b0] sm:$0xf]  ;;  %v1408_v25 = vor.u32 %v1724_v16, %v1407_v15 }
  0x39   :  { %820 = vmatpush.bf16.msrb.mxu0 %v1468_v26  ;;  %295 = vmatmul.bf16.vlgmr.msra.gmra.mxu1 %v105_v35  ;;  %v1748_v24 = vld [vmem:[#allocation8 + $0x1b8] sm:$0xf0]  ;;  %v1316_v26 = vor.u32 %v1699_v18, %v1313_v19  ;;  %v1721_v28 = vld [vmem:[#allocation8 + $0xe0] sm:$0xf0]  ;;  %v1460_v29 = vor.u32 %v1735_v20, %v1457_v22  ;;  %v1301_v31 = vld [vmem:[#allocation8 + $0x24] sm:$0xf0] }
  0x3a   :  { %833 = vmatpush.bf16.msrb.mxu1 %v1564_v34  ;;  %308 = vmatmul.bf16.vlgmr.msra.gmra.mxu2 %v105_v35  ;;  %v1696_v30 = vld [vmem:[#allocation8 + $0x1c] sm:$0xf]  ;;  %v1504_v33 = vor.u32 %v1748_v24, %v1503_v23  ;;  %v1445_v34 = vld [vmem:[#allocation8 + $0x144] sm:$0xf0]  ;;  %v1491_v35 = vld [vmem:[#allocation8 + $0x198] sm:$0xf] }
  0x3b   :  { %846 = vmatpush.bf16.msrb.mxu2 %v1376_v27  ;;  %812 = vmatpush.bf16.msra.mxu3 %v1312_v50  ;;  %v1395_v27 = vld [vmem:[#allocation8 + $0xd8] sm:$0xf]  ;;  %v1732_v32 = vld [vmem:[#allocation8 + $0x13c] sm:$0xf]  ;;  %v1745_v36 = vld [vmem:[#allocation8 + $0x1a0] sm:$0xf0]  ;;  %v1304_v38 = vor.u32 %v1696_v30, %v1301_v31 }
  0x3c   :  { %v1396_v37 = vor.u32 %v1721_v28, %v1395_v27  ;;  %v1693_v41 = vld [vmem:[#allocation8 + $0x4] sm:$0xf]  ;;  %v1448_v42 = vor.u32 %v1732_v32, %v1445_v34  ;;  %v1289_v43 = vld [vmem:[#allocation8 + $0xc] sm:$0xf0]  ;;  %v1492_v46 = vor.u32 %v1745_v36, %v1491_v35  ;;  %v1565_v48 = vld [vmem:[#allocation8 + $0x234] sm:$0xf0] }
  0x3d   :  { %821 = vmatpush.bf16.msrb.mxu0 %v1456_v39  ;;  %v1383_v39 = vld [vmem:[#allocation8 + $0xc0] sm:$0xf]  ;;  %v1729_v44 = vld [vmem:[#allocation8 + $0x124] sm:$0xf]  ;;  %v1433_v45 = vld [vmem:[#allocation8 + $0x12c] sm:$0xf0]  ;;  %v1292_v54 = vor.u32 %v1693_v41, %v1289_v43 }
  0x3e   :  { %834 = vmatpush.bf16.msrb.mxu1 %v1552_v47  ;;  %v1762_v47 = vld [vmem:[#allocation8 + $0x22c] sm:$0xf]  ;;  %v1475_v49 = vld [vmem:[#allocation8 + $0x170] sm:$0xf]  ;;  %v1740_v50 = vld [vmem:[#allocation8 + $0x178] sm:$0xf0]  ;;  %v1436_v57 = vor.u32 %v1729_v44, %v1433_v45 }
  0x3f   :  { %847 = vmatpush.bf16.msrb.mxu2 %v1364_v40  ;;  %813 = vmatpush.bf16.msra.mxu3 %v1300_v62  ;;  %v1718_v40 = vld [vmem:[#allocation8 + $0xc8] sm:$0xf0]  ;;  %v1379_v55 = vld [vmem:[#allocation8 + $0xb0] sm:$0xf]  ;;  %v1716_v56 = vld [vmem:[#allocation8 + $0xb8] sm:$0xf0]  ;;  %v1568_v58 = vor.u32 %v1762_v47, %v1565_v48  ;;  %v1476_v60 = vor.u32 %v1740_v50, %v1475_v49 }
  0x40   :  { %v1384_v53 = vor.u32 %v1718_v40, %v1383_v39  ;;  %v1421_v61 = vld [vmem:[#allocation8 + $0x114] sm:$0xf0]  ;;  %v1759_v62 = vld [vmem:[#allocation8 + $0x214] sm:$0xf]  ;;  %v1553_v63 = vld [vmem:[#allocation8 + $0x21c] sm:$0xf0]  ;;  %v1380_v3 = vor.u32 %v1716_v56, %v1379_v55 }
  0x41   :  { %822 = vmatpush.bf16.msrb.mxu0 %v1444_v51  ;;  %v1479_v51 = vld [vmem:[#allocation8 + $0x180] sm:$0xf]  ;;  %v1737_v2 = vld [vmem:[#allocation8 + $0x160] sm:$0xf0]  ;;  %v1556_v5 = vor.u32 %v1759_v62, %v1553_v63  ;;  %v1723_v7 = vld [vmem:[#allocation8 + $0xf4] sm:$0xf] }
  0x42   :  { %835 = vmatpush.bf16.msrb.mxu1 %v1540_v59  ;;  %v1726_v59 = vld [vmem:[#allocation8 + $0x10c] sm:$0xf]  ;;  %v1756_v10 = vld [vmem:[#allocation8 + $0x1fc] sm:$0xf]  ;;  %v1541_v11 = vld [vmem:[#allocation8 + $0x204] sm:$0xf0] }
  0x43   :  { %848 = vmatpush.bf16.msrb.mxu2 %v1352_v52  ;;  %814 = vmatpush.bf16.msra.mxu3 %v1288_v12  ;;  %v1742_v52 = vld [vmem:[#allocation8 + $0x188] sm:$0xf0]  ;;  %v1424_v4 = vor.u32 %v1726_v59, %v1421_v61  ;;  %v1451_v12 = vld [vmem:[#allocation8 + $0x140] sm:$0xf]  ;;  %v1367_v16 = vld [vmem:[#allocation8 + $0x98] sm:$0xf] }
  0x44   :  { %v1720_v19 = vld [vmem:[#allocation8 + $0xdc] sm:$0xf]  ;;  %v1397_v20 = vld [vmem:[#allocation8 + $0xe4] sm:$0xf0]  ;;  %v1753_v22 = vld [vmem:[#allocation8 + $0x1e4] sm:$0xf] }
  0x45   :  { %823 = vmatpush.bf16.msrb.mxu0 %v1432_v0  ;;  %v1480_v0 = vor.u32 %v1742_v52, %v1479_v51  ;;  %v1529_v23 = vld [vmem:[#allocation8 + $0x1ec] sm:$0xf0]  ;;  %v1439_v24 = vld [vmem:[#allocation8 + $0x128] sm:$0xf]  ;;  %v1355_v28 = vld [vmem:[#allocation8 + $0x80] sm:$0xf] }
  0x46   :  { %836 = vmatpush.bf16.msrb.mxu1 %v1528_v8  ;;  %v1409_v8 = vld [vmem:[#allocation8 + $0xfc] sm:$0xf0]  ;;  %v1717_v31 = vld [vmem:[#allocation8 + $0xc4] sm:$0xf]  ;;  %v1385_v32 = vld [vmem:[#allocation8 + $0xcc] sm:$0xf0] }
  0x47   :  { %849 = vmatpush.bf16.msrb.mxu2 %v1340_v1  ;;  %859 = vmatpush.bf16.msrb.mxu3 %v1472_v17  ;;  %v1463_v1 = vld [vmem:[#allocation8 + $0x158] sm:$0xf]  ;;  %v1412_v9 = vor.u32 %v1723_v7, %v1409_v8  ;;  %v1713_v17 = vld [vmem:[#allocation8 + $0xa0] sm:$0xf0]  ;;  %v1750_v34 = vld [vmem:[#allocation8 + $0x1cc] sm:$0xf] }
  0x48   :  { %v1464_v6 = vor.u32 %v1737_v2, %v1463_v1  ;;  %v1368_v18 = vor.u32 %v1713_v17, %v1367_v16  ;;  %v1517_v35 = vld [vmem:[#allocation8 + $0x1d4] sm:$0xf0]  ;;  %v1343_v40 = vld [vmem:[#allocation8 + $0x68] sm:$0xf]  ;;  %v1707_v41 = vld [vmem:[#allocation8 + $0x70] sm:$0xf0] }
  0x49   :  { %824 = vmatpush.bf16.msrb.mxu0 %v1420_v13  ;;  %v1544_v13 = vor.u32 %v1756_v10, %v1541_v11  ;;  %v1520_v36 = vor.u32 %v1750_v34, %v1517_v35  ;;  %v1747_v43 = vld [vmem:[#allocation8 + $0x1b4] sm:$0xf]  ;;  %v1505_v44 = vld [vmem:[#allocation8 + $0x1bc] sm:$0xf0]  ;;  %v1415_v45 = vld [vmem:[#allocation8 + $0xf8] sm:$0xf] }
  0x4a   :  { %837 = vmatpush.bf16.msrb.mxu1 %v1516_v21  ;;  %v1400_v21 = vor.u32 %v1720_v19, %v1397_v20  ;;  %v1725_v47 = vld [vmem:[#allocation8 + $0x100] sm:$0xf0]  ;;  %v1331_v49 = vld [vmem:[#allocation8 + $0x50] sm:$0xf]  ;;  %v1704_v50 = vld [vmem:[#allocation8 + $0x58] sm:$0xf0] }
  0x4b   :  { %850 = vmatpush.bf16.msrb.mxu2 %v1328_v14  ;;  %860 = vmatpush.bf16.msrb.mxu3 %v1460_v29  ;;  %v1734_v14 = vld [vmem:[#allocation8 + $0x148] sm:$0xf0]  ;;  %v1416_v48 = vor.u32 %v1725_v47, %v1415_v45  ;;  %v1332_v51 = vor.u32 %v1704_v50, %v1331_v49  ;;  %v1744_v52 = vld [vmem:[#allocation8 + $0x19c] sm:$0xf]  ;;  %v1701_v59 = vld [vmem:[#allocation8 + $0x40] sm:$0xf0] }
  0x4c   :  { %v1452_v15 = vor.u32 %v1734_v14, %v1451_v12  ;;  %v1710_v29 = vld [vmem:[#allocation8 + $0x88] sm:$0xf0]  ;;  %v1481_v62 = vld [vmem:[#allocation8 + $0x18c] sm:$0xf0]  ;;  %v1391_v63 = vld [vmem:[#allocation8 + $0xc8] sm:$0xf] }
  0x4d   :  { %825 = vmatpush.bf16.msrb.mxu0 %v1408_v25  ;;  %v1532_v25 = vor.u32 %v1753_v22, %v1529_v23  ;;  %v1356_v30 = vor.u32 %v1710_v29, %v1355_v28  ;;  %v1722_v56 = vld [vmem:[#allocation8 + $0xe8] sm:$0xf0]  ;;  %v1695_v7 = vld [vmem:[#allocation8 + $0x10] sm:$0xf0]  ;;  %v1764_v16 = vld [vmem:[#allocation8 + $0x238] sm:$0xf0] }
  0x4e   :  { %838 = vmatpush.bf16.msrb.mxu1 %v1504_v33  ;;  %v1388_v33 = vor.u32 %v1717_v31, %v1385_v32  ;;  %v1559_v23 = vld [vmem:[#allocation8 + $0x218] sm:$0xf]  ;;  %v1547_v32 = vld [vmem:[#allocation8 + $0x200] sm:$0xf]  ;;  %v1769_v45 = vld [vmem:[#allocation11 + $0x20] sm:$0xff]  ;;  %s1963_s12 = smov [#allocation12]  }
  0x4f   :  { %851 = vmatpush.bf16.msrb.mxu2 %v1316_v26  ;;  %861 = vmatpush.bf16.msrb.mxu3 %v1448_v42  ;;  %v1731_v26 = vld [vmem:[#allocation8 + $0x130] sm:$0xf0]  ;;  %v1344_v42 = vor.u32 %v1707_v41, %v1343_v40  ;;  %v1770_v40 = vld [vmem:[#allocation11 + $0x28] sm:$0xff]  ;;  %v1511_v47 = vld [vmem:[#allocation8 + $0x1b8] sm:$0xf]  ;;  %s1175_s13 = sshll.u32 %s1963_s12, 4  ;;  %s1176_s13 = int_to_ptr.vmem [resolvable:$true] %s1175_s13 }
  0x50   :  { %v1440_v27 = vor.u32 %v1731_v26, %v1439_v24  ;;  %v1761_v24 = vld [vmem:[#allocation8 + $0x220] sm:$0xf0]  ;;  %v1771_v34 = vld [vmem:[#allocation11 + $0x30] sm:$0xff]  ;;  %v1499_v50 = vld [vmem:[#allocation8 + $0x1a0] sm:$0xf]  ;;  %s1177_s16 = sshll.u32 %s2044_s8, 4  ;;  %s1178_s16 = int_to_ptr.hbm [resolvable:$true] %s1177_s16 }
  0x51   :  { %826 = vmatpush.bf16.msrb.mxu0 %v1396_v37  ;;  %v1427_v37 = vld [vmem:[#allocation8 + $0x110] sm:$0xf] }
  0x52   :  { %839 = vmatpush.bf16.msrb.mxu1 %v1492_v46  ;;  %v1508_v46 = vor.u32 %v1747_v43, %v1505_v44  ;;  %v1523_v43 = vld [vmem:[#allocation8 + $0x1d0] sm:$0xf]  ;;  %v1752_v44 = vld [vmem:[#allocation8 + $0x1d8] sm:$0xf0] }
  0x53   :  { %852 = vmatpush.bf16.msrb.mxu2 %v1304_v38  ;;  %862 = vmatpush.bf16.msrb.mxu3 %v1436_v57  ;;  %v1728_v38 = vld [vmem:[#allocation8 + $0x118] sm:$0xf0] }
  0x54   :  { %v1428_v39 = vor.u32 %v1728_v38, %v1427_v37  ;;  %v1535_v38 = vld [vmem:[#allocation8 + $0x1e8] sm:$0xf] }
  0x55   :  { %827 = vmatpush.bf16.msrb.mxu0 %v1384_v53  ;;  %v1493_v53 = vld [vmem:[#allocation8 + $0x1a4] sm:$0xf0] }
  0x56   :  { %840 = vmatpush.bf16.msrb.mxu1 %v1480_v0  ;;  %v1496_v55 = vor.u32 %v1744_v52, %v1493_v53  ;;  %v1719_v0 = vld [vmem:[#allocation8 + $0xd0] sm:$0xf0]  ;;  %v1487_v53 = vld [vmem:[#allocation8 + $0x188] sm:$0xf] }
  0x57   :  { %853 = vmatpush.bf16.msrb.mxu2 %v1292_v54  ;;  %863 = vmatpush.bf16.msrb.mxu3 %v1424_v4  ;;  %v1403_v54 = vld [vmem:[#allocation8 + $0xe0] sm:$0xf]  ;;  %v1392_v2 = vor.u32 %v1719_v0, %v1391_v63  ;;  %v1698_v4 = vld [vmem:[#allocation8 + $0x28] sm:$0xf0]  ;;  %v1765_v63 = vld [vmem:[#allocation11] sm:$0xff] }
  0x58   :  { %v1404_v57 = vor.u32 %v1722_v56, %v1403_v54  ;;  %v1743_v54 = vld [vmem:[#allocation8 + $0x190] sm:$0xf0]  ;;  %v1780_v56 = vld [vmem:[#allocation11 + $0x78] sm:$0xff] }
  0x59   :  { %872 = vmatpush.bf16.msra.mxu0 %v1568_v58  ;;  %v1319_v58 = vld [vmem:[#allocation8 + $0x38] sm:$0xf]  ;;  %v1788_v0 = vld [vmem:[#allocation11 + $0xb8] sm:$0xff] }
  0x5a   :  { %885 = vmatpush.bf16.msra.mxu1 %v1380_v3  ;;  %v1320_v61 = vor.u32 %v1701_v59, %v1319_v58  ;;  %v1307_v3 = vld [vmem:[#allocation8 + $0x20] sm:$0xf]  ;;  %v1779_v58 = vld [vmem:[#allocation11 + $0x70] sm:$0xff] }
  0x5b   :  { %898 = vmatpush.bf16.msra.mxu2 %v1476_v60  ;;  %864 = vmatpush.bf16.msrb.mxu3 %v1412_v9  ;;  %v1741_v60 = vld [vmem:[#allocation8 + $0x184] sm:$0xf]  ;;  %v138_v9 = vld [vmem:[%s2039_s3] sm:$0x7]  ;;  %v1767_v59 = vld [vmem:[#allocation11 + $0x10] sm:$0xff] }
  0x5c   :  { %v1484_v1 = vor.u32 %v1741_v60, %v1481_v62  ;;  %v140_v10 = vperm.slane %v138_v9, 0  ;;  %v141_v11 = vperm.slane %v138_v9, 1  ;;  %v142_v20 = vperm.slane %v138_v9, 2  ;;  %v1778_v60 = vld [vmem:[#allocation11 + $0x68] sm:$0xff]  ;;  %v1777_v62 = vld [vmem:[#allocation11 + $0x60] sm:$0xff]  ;;  %v1783_v9 = vld [vmem:[#allocation11 + $0x90] sm:$0xff] }
  0x5d   :  { %873 = vmatpush.bf16.msra.mxu0 %v1556_v5  ;;  %v1308_v5 = vor.u32 %v1698_v4, %v1307_v3  ;;  %v1775_v3 = vld [vmem:[#allocation11 + $0x50] sm:$0xff]  ;;  %v1786_v4 = vld [vmem:[#allocation11 + $0xa8] sm:$0xff] }
  0x5e   :  { %886 = vmatpush.bf16.msra.mxu1 %v1368_v18 }
  0x5f   :  { %899 = vmatpush.bf16.msra.mxu2 %v1464_v6  ;;  %865 = vmatpush.bf16.msrb.mxu3 %v1400_v21  ;;  %v1295_v6 = vld [vmem:[#allocation8 + $0x8] sm:$0xf] }
  0x60   :  { %v1296_v8 = vor.u32 %v1695_v7, %v1295_v6  ;;  %v1785_v6 = vld [vmem:[#allocation11 + $0xa0] sm:$0xff] }
  0x61   :  { %874 = vmatpush.bf16.msra.mxu0 %v1544_v13  ;;  %v1773_v7 = vld [vmem:[#allocation11 + $0x40] sm:$0xff] }
  0x62   :  { %887 = vmatpush.bf16.msra.mxu1 %v1356_v30  ;;  %v1560_v30 = vor.u32 %v1761_v24, %v1559_v23 }
  0x63   :  { %900 = vmatpush.bf16.msra.mxu2 %v1452_v15  ;;  %866 = vmatpush.bf16.msrb.mxu3 %v1388_v33  ;;  %v1571_v15 = vld [vmem:[#allocation8 + $0x230] sm:$0xf]  ;;  %v1758_v33 = vld [vmem:[#allocation8 + $0x208] sm:$0xf0] }
  0x64   :  { %v1572_v21 = vor.u32 %v1764_v16, %v1571_v15  ;;  %v1548_v37 = vor.u32 %v1758_v33, %v1547_v32 }
  0x65   :  { %875 = vmatpush.bf16.msra.mxu0 %v1532_v25 }
  0x66   :  { %888 = vmatpush.bf16.msra.mxu1 %v1344_v42 }
  0x67   :  { %901 = vmatpush.bf16.msra.mxu2 %v1440_v27  ;;  %v1772_v27 = vld [vmem:[#allocation11 + $0x38] sm:$0xff] }
  0x69   :  { %876 = vmatpush.bf16.msra.mxu0 %v1520_v36 }
  0x6a   :  { %889 = vmatpush.bf16.msra.mxu1 %v1332_v51  ;;  %v1746_v51 = vld [vmem:[#allocation8 + $0x1a8] sm:$0xf0] }
  0x6b   :  { %902 = vmatpush.bf16.msra.mxu2 %v1428_v39  ;;  %v1755_v39 = vld [vmem:[#allocation8 + $0x1f0] sm:$0xf0]  ;;  %v1500_v52 = vor.u32 %v1746_v51, %v1499_v50 }
  0x6c   :  { %v1536_v42 = vor.u32 %v1755_v39, %v1535_v38 }
  0x6d   :  { %877 = vmatpush.bf16.msra.mxu0 %v1508_v46  ;;  %v1524_v46 = vor.u32 %v1752_v44, %v1523_v43 }
  0x6e   :  { %890 = vmatpush.bf16.msra.mxu1 %v1320_v61  ;;  %v1766_v61 = vld [vmem:[#allocation11 + $0x8] sm:$0xff] }
  0x6f   :  { %903 = vmatpush.bf16.msra.mxu2 %v1416_v48  ;;  %v1749_v48 = vld [vmem:[#allocation8 + $0x1c0] sm:$0xf0] }
  0x70   :  { %v1512_v49 = vor.u32 %v1749_v48, %v1511_v47 }
  0x71   :  { %878 = vmatpush.bf16.msra.mxu0 %v1496_v55  ;;  %v1488_v55 = vor.u32 %v1743_v54, %v1487_v53  ;;  %v1799_v53 = vld [vmem:[%s2043_s7] ss:$0 sm:$0xff] }
  0x72   :  { %891 = vmatpush.bf16.msra.mxu1 %v1308_v5  ;;  %v1774_v5 = vld [vmem:[#allocation11 + $0x48] sm:$0xff] }
  0x73   :  { %904 = vmatpush.bf16.msra.mxu2 %v1404_v57  ;;  %v1768_v57 = vld [vmem:[#allocation11 + $0x18] sm:$0xff] }
  0x75   :  { %879 = vmatpush.bf16.msra.mxu0 %v1484_v1  ;;  %v1776_v1 = vld [vmem:[#allocation11 + $0x58] sm:$0xff] }
  0x76   :  { %892 = vmatpush.bf16.msra.mxu1 %v1296_v8  ;;  %v1784_v8 = vld [vmem:[#allocation11 + $0x98] sm:$0xff] }
  0x77   :  { %905 = vmatpush.bf16.msra.mxu2 %v1392_v2  ;;  %v1787_v2 = vld [vmem:[#allocation11 + $0xb0] sm:$0xff] }
  0xb5   :  { %v283_v12 = vpop.f32.mrf.mxu0 }
  0xb6   :  { %v284_v13 = vadd.f32 %v283_v12, %v140_v10  ;;  %v296_v14 = vpop.f32.mrf.mxu1  ;;  %v415_v10 = vld [vmem:[#allocation9] sm:$0x7] }
  0xb7   :  { %v297_v17 = vadd.f32 %v296_v14, %v141_v11  ;;  %v417_v12 = vperm.slane %v415_v10, 0  ;;  %v419_v38 = vperm.slane %v415_v10, 2 }
  0xb8   :  { %v313_v18 = vmax.f32 %v284_v13, 0.0  ;;  %v1782_v13 = vld [vmem:[#allocation11 + $0x88] sm:$0xff] }
  0xb9   :  { %v314_v19 = vmax.f32 %v297_v17, 0.0 }
  0xba   :  { %v316_v22 = vpack.c.bf16 %v313_v18, %v313_v18 }
  0xbb   :  { %v317_v25 = vpack.c.bf16 %v314_v19, %v314_v19 }
  0xbc   :  { %815 = vmatmul.bf16.vlgmr.msra.gmra.mxu3 %v316_v22  ;;  %854 = vmatmul.bf16.vlgmr.msrb.gmra.mxu2 %v316_v22 }
  0xbd   :  { %v309_v26 = vpop.f32.mrf.mxu2  ;;  %828 = vmatmul.bf16.vlgmr.msrb.gmra.mxu0 %v317_v25  ;;  %v285_v29 = vpop.f32.mrf.mxu0  ;;  %911 = vmatpush.bf16.msra.mxu3 %v1572_v21 }
  0xbe   :  { %v310_v28 = vadd.f32 %v309_v26, %v142_v20  ;;  %v298_v31 = vpop.f32.mrf.mxu1  ;;  %1126 = vmatpush.bf16.msrb.mxu0 %v1772_v27  ;;  %1152 = vmatpush.bf16.msrb.mxu2 %v1788_v0  ;;  %v1781_v20 = vld [vmem:[#allocation11 + $0x80] sm:$0xff]  ;;  %v418_v27 = vperm.slane %v415_v10, 1 }
  0xc0   :  { %v315_v35 = vmax.f32 %v310_v28, 0.0 }
  0xc1   :  { %912 = vmatpush.bf16.msra.mxu3 %v1560_v30 }
  0xc2   :  { %v318_v36 = vpack.c.bf16 %v315_v35, %v315_v35  ;;  %1127 = vmatpush.bf16.msrb.mxu0 %v1771_v34  ;;  %1153 = vmatpush.bf16.msrb.mxu2 %v1787_v2 }
  0xc4   :  { %841 = vmatmul.bf16.vlgmr.msrb.gmra.mxu1 %v318_v36 }
  0xc5   :  { %v311_v41 = vpop.f32.mrf.mxu2  ;;  %913 = vmatpush.bf16.msra.mxu3 %v1548_v37  ;;  %1139 = vmatpush.bf16.msrb.mxu1 %v1780_v56 }
  0xc6   :  { %1128 = vmatpush.bf16.msrb.mxu0 %v1770_v40  ;;  %1154 = vmatpush.bf16.msrb.mxu2 %v1786_v4 }
  0xc9   :  { %914 = vmatpush.bf16.msra.mxu3 %v1536_v42  ;;  %1140 = vmatpush.bf16.msrb.mxu1 %v1779_v58  ;;  %v1167_v58 = vstv %s2036_s0 }
  0xca   :  { %1129 = vmatpush.bf16.msrb.mxu0 %v1769_v45  ;;  %1155 = vmatpush.bf16.msrb.mxu2 %v1785_v6 }
  0xcc   :  { %867 = vmatmul.bf16.vlgmr.msrb.gmra.mxu3 %v317_v25  ;;  %906 = vmatmul.bf16.vlgmr.msra.gmra.mxu2 %v317_v25 }
  0xcd   :  { %880 = vmatmul.bf16.vlgmr.msra.gmra.mxu0 %v318_v36  ;;  %915 = vmatpush.bf16.msra.mxu3 %v1524_v46 }
  0xce   :  { %1130 = vmatpush.bf16.msrb.mxu0 %v1768_v57  ;;  %1141 = vmatpush.bf16.msrb.mxu1 %v1778_v60 }
  0xcf   :  { %1156 = vmatpush.bf16.msrb.mxu2 %v1784_v8 }
  0xd1   :  { %916 = vmatpush.bf16.msra.mxu3 %v1512_v49 }
  0xd2   :  { %1131 = vmatpush.bf16.msrb.mxu0 %v1767_v59  ;;  %1142 = vmatpush.bf16.msrb.mxu1 %v1777_v62 }
  0xd3   :  { %1157 = vmatpush.bf16.msrb.mxu2 %v1783_v9 }
  0xd4   :  { %893 = vmatmul.bf16.vlgmr.msra.gmra.mxu1 %v316_v22 }
  0xd5   :  { %917 = vmatpush.bf16.msra.mxu3 %v1500_v52 }
  0xd6   :  { %1132 = vmatpush.bf16.msrb.mxu0 %v1766_v61  ;;  %1143 = vmatpush.bf16.msrb.mxu1 %v1776_v1 }
  0xd7   :  { %1158 = vmatpush.bf16.msrb.mxu2 %v1782_v13 }
  0xd9   :  { %918 = vmatpush.bf16.msra.mxu3 %v1488_v55 }
  0xda   :  { %1133 = vmatpush.bf16.msrb.mxu0 %v1765_v63  ;;  %1144 = vmatpush.bf16.msrb.mxu1 %v1775_v3 }
  0xdb   :  { %1159 = vmatpush.bf16.msrb.mxu2 %v1781_v20 }
  0xdc   :  { %919 = vmatmul.bf16.vlgmr.msra.gmra.mxu3 %v318_v36 }
  0xde   :  { %1145 = vmatpush.bf16.msrb.mxu1 %v1774_v5 }
  0xe2   :  { %1146 = vmatpush.bf16.msrb.mxu1 %v1773_v7 }
 0x13a   :  { %v829_v11 = vpop.f32.mrf.mxu0 }
 0x13f   :  { %v816_v14 = vpop.f32.mrf.mxu3  ;;  %v855_v15 = vpop.f32.mrf.mxu2 }
 0x140   :  { %v817_v16 = vadd.f32 %v816_v14, %v417_v12  ;;  %v856_v29 = vadd.f32 %v855_v15, %v418_v27 }
 0x141   :  { %v842_v17 = vpop.f32.mrf.mxu1 }
 0x142   :  { %v830_v18 = vadd.f32 %v829_v11, %v817_v16  ;;  %v831_v19 = vpop.f32.mrf.mxu0 }
 0x144   :  { %v843_v21 = vadd.f32 %v842_v17, %v830_v18 }
 0x146   :  { %v924_v22 = vmax.f32 %v843_v21, 0.0 }
 0x147   :  { %v818_v23 = vpop.f32.mrf.mxu3  ;;  %v857_v24 = vpop.f32.mrf.mxu2 }
 0x148   :  { %v927_v25 = vpack.c.bf16 %v924_v22, %v924_v22 }
 0x149   :  { %v844_v26 = vpop.f32.mrf.mxu1 }
 0x14a   :  { %v881_v28 = vpop.f32.mrf.mxu0  ;;  %1134 = vmatmul.bf16.vlgmr.msrb.gmra.mxu0 %v927_v25 }
 0x14f   :  { %v868_v30 = vpop.f32.mrf.mxu3  ;;  %v907_v31 = vpop.f32.mrf.mxu2 }
 0x150   :  { %v869_v32 = vadd.f32 %v868_v30, %v856_v29 }
 0x151   :  { %v894_v33 = vpop.f32.mrf.mxu1 }
 0x152   :  { %v882_v34 = vadd.f32 %v881_v28, %v869_v32  ;;  %v883_v35 = vpop.f32.mrf.mxu0  ;;  %v895_v42 = vadd.f32 %v894_v33, %v419_v38 }
 0x154   :  { %v925_v36 = vmax.f32 %v882_v34, 0.0  ;;  %v908_v43 = vadd.f32 %v907_v31, %v895_v42 }
 0x156   :  { %v928_v37 = vpack.c.bf16 %v925_v36, %v925_v36 }
 0x157   :  { %v870_v39 = vpop.f32.mrf.mxu3  ;;  %v909_v40 = vpop.f32.mrf.mxu2 }
 0x158   :  { %1147 = vmatmul.bf16.vlgmr.msrb.gmra.mxu1 %v928_v37 }
 0x159   :  { %v896_v41 = vpop.f32.mrf.mxu1 }
 0x15f   :  { %v920_v44 = vpop.f32.mrf.mxu3 }
 0x160   :  { %v921_v45 = vadd.f32 %v920_v44, %v908_v43 }
 0x162   :  { %v926_v46 = vmax.f32 %v921_v45, 0.0 }
 0x164   :  { %v929_v47 = vpack.c.bf16 %v926_v46, %v926_v46 }
 0x166   :  { %1160 = vmatmul.bf16.vlgmr.msrb.gmra.mxu2 %v929_v47 }
 0x167   :  { %v922_v48 = vpop.f32.mrf.mxu3 }
 0x1c7   :  { %v1135_v49 = vpop.f32.mrf.mxu0 }
 0x1c8   :  { %v1136_v54 = vadd.f32 %v1799_v53, %v1135_v49 }
 0x1cf   :  { %v1137_v50 = vpop.f32.mrf.mxu0 }
 0x1d5   :  { %v1148_v51 = vpop.f32.mrf.mxu1 }
 0x1d6   :  { %v1149_v55 = vadd.f32 %v1148_v51, %v1136_v54 }
 0x1dd   :  { %v1150_v52 = vpop.f32.mrf.mxu1 }
 0x1e9   :  { %v1161_v56 = vpop.f32.mrf.mxu2 }
 0x1ea   :  { %v1162_v57 = vadd.f32 %v1161_v56, %v1149_v55 }
 0x1ec   :  { %1800 = vtanh.f32 %v1162_v57 }
 0x1f1   :  { %v1163_v59 = vpop.f32.mrf.mxu2 }
 0x1f2   :  { %v1801_v60 = vpop.eup %1800 }
 0x1f3   :  { %v1168_v61 = vmul.f32 %v1801_v60, %v1167_v58 }
 0x1f5   :  { %1169 = vst [vmem:[#allocation12] sm:$0x3] %v1168_v61 }
 0x1f6   :  { %1180 = dma.vmem_to_hbm [thread:$0]  %s1176_s13, 32, %s1178_s16, [#allocation5]  }
 0x1f7   :  { %1952 = dma.done.wait [#allocation5], 32  }
 0x1f8   :  { %1953 = vsyncadd [#allocation5], 4294967264 }
 0x1f9   :  { %1185 = vsyncpa [#allocation4], 1 }
 0x1fa   :  { %1186 = vsyncpa [#allocation7], 1 }
 0x1fb   :  { %1187 = vsyncpa [#allocation10], 1 }
 0x1fc   :  { %1188 = vsyncpa [#allocation5], 1 }

</bundles_post_ra>
